<compile_context>
chip_gen: v7x
topology: tpu7x:2x2x1
jax: 0.10.0
libtpu: 0.0.40
codegen_flags: <defaults>
</compile_context>

<pallas_src>
import jax
import jax.numpy as jnp
from jax.experimental import pallas as pl
from jax.experimental.pallas import tpu as pltpu


def _round_up(x: int, m: int) -> int:
    return ((x + m - 1) // m) * m


def _one_hot_kernel(types_ref, out_ref):
    # types_ref: (TN, 1) int32 tile, node axis on sublanes.
    # out_ref:   (TN, num_types) float tile, type axis on lanes.
    tn, k = out_ref.shape
    t = types_ref[...]                                        # (TN, 1) int32
    col = jax.lax.broadcasted_iota(jnp.int32, (tn, k), 1)     # (TN, K) lane iota
    out_ref[...] = (col == t).astype(out_ref.dtype)           # lane-broadcast compare


def _select_node_tile(n: int, num_types: int, dtype_size: int) -> int:
    """Pick node tile TN from a padded-VMEM budget (double buffered)."""
    # Physical VMEM row bytes: last dim padded to 128 lanes for both the
    # (TN, num_types) output block and the (TN, 1) int32 types block.
    out_row = _round_up(max(num_types, 1), 128) * dtype_size
    types_row = 128 * 4
    per_row = 2 * (out_row + types_row)            # x2: double buffering
    budget = 16 * 1024 * 1024                      # conservative across v5e..v7x
    tn_cap = max(512, (budget // per_row) // 8 * 8)
    # Keep >= 4 "parallel" grid steps for large N so v7x can shard the node
    # axis across both TensorCores (no-op on single-TC v5e/v6e).
    tn = min(tn_cap, max(512, _round_up(pl.cdiv(n, 4), 8)))
    if n <= tn:
        return n                                   # single full-array block
    return tn


def one_hot_atom_encoding(data: dict, num_types: int, set_features: bool = True, *,
                          out_dtype=None,
                          xla_fastpath_max_bytes: int = 256 * 1024,
                          force_pallas: bool = False) -> dict:
    """Pallas equivalent of OneHotAtomEncoding.forward.

    data["atom_types"]: [N, 1] (or [N]) integer array of discrete atom types.
    data["pos"]:        [N, 3] positions (only the dtype is used, as in PyTorch).
    Returns a new dict with "node_attrs" (and optionally "node_features") set
    to the [N, num_types] one-hot encoding in positions' dtype (or out_dtype).

    Note: types outside [0, num_types) silently produce all-zero rows (same
    for the Pallas and jax.nn.one_hot paths), unlike torch's one_hot which
    raises.
    """
    types = jnp.asarray(data["atom_types"])
    if types.ndim == 2 and types.shape[-1] == 1:
        types = types[:, 0]                        # torch .squeeze(-1)
    types = types.astype(jnp.int32)
    n = types.shape[0]

    if out_dtype is None:
        out_dtype = data["pos"].dtype
    out_dtype = jnp.dtype(out_dtype)
    if out_dtype == jnp.dtype("float64"):
        # TODO(synk): TPU Pallas has no f64; f64 positions downgrade the encoding to f32.
        out_dtype = jnp.dtype(jnp.float32)

    dtype_size = out_dtype.itemsize
    total_bytes = n * num_types * dtype_size

    if n == 0 or (not force_pallas and total_bytes < xla_fastpath_max_bytes):
        # Tiny graphs: a single fused XLA op beats the pallas_call glue.
        one_hot = jax.nn.one_hot(types, num_types, dtype=out_dtype)
    else:
        tn = _select_node_tile(n, num_types, dtype_size)
        grid = (pl.cdiv(n, tn),)

        # Padded, double-buffered VMEM footprint estimate -> explicit limit
        # with headroom (v5e's default scoped limit is only 16 MiB; cap below
        # v7x's 64 MiB physical VMEM).
        est_vmem = 2 * tn * (_round_up(max(num_types, 1), 128) * dtype_size + 128 * 4)
        vmem_limit = int(min(48 * 1024 * 1024, max(32 * 1024 * 1024, 2 * est_vmem)))

        one_hot = pl.pallas_call(
            _one_hot_kernel,
            out_shape=jax.ShapeDtypeStruct((n, num_types), out_dtype),
            grid=grid,
            in_specs=[pl.BlockSpec((tn, 1), lambda i: (i, 0))],
            out_specs=pl.BlockSpec((tn, num_types), lambda i: (i, 0)),
            compiler_params=pltpu.CompilerParams(
                dimension_semantics=("parallel",),
                vmem_limit_bytes=vmem_limit),
            cost_estimate=pl.CostEstimate(
                flops=0, transcendentals=0,
                bytes_accessed=total_bytes + n * 4),
        )(types.reshape(n, 1))

    out = dict(data)
    out["node_attrs"] = one_hot
    if set_features:
        out["node_features"] = one_hot
    return out


if __name__ == "__main__":
    key = jax.random.PRNGKey(0)
    k1, k2, k3, k4, k5, k6, k7, k8 = jax.random.split(key, 8)

    # Case 1: tiny graph, [N, 1] atom types (module's canonical input shape),
    # Pallas path forced so the kernel is exercised at small N.
    n1, k_types1 = 16, 5
    atom_types1 = jax.random.randint(k1, (n1, 1), 0, k_types1, dtype=jnp.int32)
    pos1 = jax.random.normal(k2, (n1, 3), dtype=jnp.float32)
    out1 = one_hot_atom_encoding({"atom_types": atom_types1, "pos": pos1},
                                 num_types=k_types1, set_features=True,
                                 force_pallas=True)
    attrs1 = jax.block_until_ready(out1["node_attrs"])
    feats1 = jax.block_until_ready(out1["node_features"])
    ref1 = jax.nn.one_hot(atom_types1[:, 0], k_types1, dtype=pos1.dtype)
    assert attrs1.shape == (n1, k_types1) and attrs1.dtype == pos1.dtype
    assert jnp.array_equal(attrs1, ref1) and jnp.array_equal(feats1, ref1)

    # Case 2: N > tile and not a multiple of it -> exercises the ragged last
    # block (masked writeback); 1-D atom types and set_features=False.
    n2, k_types2 = 1000, 6
    atom_types2 = jax.random.randint(k3, (n2,), 0, k_types2, dtype=jnp.int32)
    pos2 = jax.random.normal(k4, (n2, 3), dtype=jnp.float32)
    out2 = one_hot_atom_encoding({"atom_types": atom_types2, "pos": pos2},
                                 num_types=k_types2, set_features=False,
                                 force_pallas=True)
    attrs2 = jax.block_until_ready(out2["node_attrs"])
    ref2 = jax.nn.one_hot(atom_types2, k_types2, dtype=pos2.dtype)
    assert attrs2.shape == (n2, k_types2)
    assert "node_features" not in out2
    assert jnp.array_equal(attrs2, ref2)

    # Case 3: large-enough graph to take the Pallas path through the size
    # heuristic, bf16 positions (bf16 output halves the write traffic).
    n3, k_types3 = 40000, 7
    atom_types3 = jax.random.randint(k5, (n3, 1), 0, k_types3, dtype=jnp.int32)
    pos3 = jax.random.normal(k6, (n3, 3), dtype=jnp.bfloat16)
    out3 = one_hot_atom_encoding({"atom_types": atom_types3, "pos": pos3},
                                 num_types=k_types3, set_features=True)
    attrs3 = jax.block_until_ready(out3["node_attrs"])
    ref3 = jax.nn.one_hot(atom_types3[:, 0], k_types3, dtype=jnp.bfloat16)
    assert attrs3.shape == (n3, k_types3) and attrs3.dtype == jnp.bfloat16
    assert jnp.array_equal(attrs3, ref3)

    # Case 4: small-N fast path (plain jax.nn.one_hot) and N == 0 edge case.
    n4, k_types4 = 64, 4
    atom_types4 = jax.random.randint(k7, (n4,), 0, k_types4, dtype=jnp.int32)
    pos4 = jax.random.normal(k8, (n4, 3), dtype=jnp.float32)
    out4 = one_hot_atom_encoding({"atom_types": atom_types4, "pos": pos4},
                                 num_types=k_types4)
    attrs4 = jax.block_until_ready(out4["node_attrs"])
    assert jnp.array_equal(attrs4, jax.nn.one_hot(atom_types4, k_types4, dtype=pos4.dtype))

    out0 = one_hot_atom_encoding(
        {"atom_types": jnp.zeros((0, 1), jnp.int32),
         "pos": jnp.zeros((0, 3), jnp.float32)}, num_types=3)
    assert jax.block_until_ready(out0["node_attrs"]).shape == (0, 3)

    print("KERNEL_OK")
</pallas_src>

<mosaic_0001>
module attributes {stable_mosaic.version = 11 : i64} {
  func.func @_one_hot_kernel(%arg0: i32, %arg1: memref<16x1xi32, #tpu.memory_space<vmem>>, %arg2: memref<16x5xf32, #tpu.memory_space<vmem>>) attributes {dimension_semantics = [#tpu.dimension_semantics<parallel>], iteration_bounds = array<i64: 1>, scalar_prefetch = 0 : i64, scratch_operands = 0 : i64, tpu.core_type = #tpu.core_type<tc>, window_params = [{transform_indices = @transform_0, window_bounds = array<i64: 16, 1>}, {transform_indices = @transform_1, window_bounds = array<i64: 16, 5>}]} {
    %c0 = arith.constant 0 : index
    %c0_0 = arith.constant 0 : index
    %0 = vector.load %arg1[%c0, %c0_0] : memref<16x1xi32, #tpu.memory_space<vmem>>, vector<16x1xi32>
    %1 = tpu.iota {dimensions = array<i32: 1>} : vector<16x5xi32>
    %2 = vector.broadcast %0 : vector<16x1xi32> to vector<16x5xi32>
    %3 = arith.cmpi eq, %1, %2 : vector<16x5xi32>
    %4 = arith.extui %3 : vector<16x5xi1> to vector<16x5xi32>
    %5 = arith.sitofp %4 : vector<16x5xi32> to vector<16x5xf32>
    %c0_1 = arith.constant 0 : index
    %c0_2 = arith.constant 0 : index
    %6 = vector.load %arg2[%c0_1, %c0_2] : memref<16x5xf32, #tpu.memory_space<vmem>>, vector<16x5xf32>
    tpu.vector_store %arg2[%c0_1, %c0_2], %5 {strides = array<i32>} : memref<16x5xf32, #tpu.memory_space<vmem>>, vector<16x5xf32>,
    return
  }
  func.func @transform_0(%arg0: i32) -> (i32, i32) {
    %c0_i32 = arith.constant 0 : i32
    %c0_i32_0 = arith.constant 0 : i32
    return %arg0, %c0_i32 : i32, i32
  }
  func.func @transform_1(%arg0: i32) -> (i32, i32) {
    %c0_i32 = arith.constant 0 : i32
    %c0_i32_0 = arith.constant 0 : i32
    return %arg0, %c0_i32 : i32, i32
  }
}

</mosaic_0001>

<bundles_post_ra>
// kernel: tpu_custom_call.1
= control target key start
LH: loop header
LB: loop body
LE: loop exit
PB: predicated region body
PF: predicated region fallthrough
CT: control target
= control target key end

     0   :  { %v36_v0 = vmov 0   ;;  %v10_v3 = vlaneseq  ;;  %vm24_vm0 = vcmask 39936   ;;  %v37_v6 = vmov 0.0   ;;  %s60_s0 = inlined_call_operand.vmem [shape: s32[16,1], index: 0, kind: input, shape index: {}]   ;;  %s61_s1 = inlined_call_operand.vmem [shape: f32[16,5], index: 1, kind: output, shape index: {}]  }
   0x1   :  { %35 = vset.pattern.permute.xlu0 %v36_v0  ;;  %v8_v1 = vld [vmem:[%s60_s0] sm:$0xff]  ;;  %v9_v2 = vld [vmem:[%s60_s0 + $0x8] sm:$0xff] }
   0x2   :  { %13 = vperm.xlu0 %35, %v8_v1   ;;  %v11_v4 = vand.u32 127, %v10_v3 }
   0x6   :  { %16 = vperm.xlu0 %35, %v9_v2  }
  0x81   :  { %v14_v5 = vpop.permute.xlu0 %13 }
  0x82   :  { %vm18_vm1 = vcmp.eq.s32.totalorder %v11_v4, %v14_v5 }
  0x83   :  { %v31_v7 = vsel %vm18_vm1, 1.0, %v37_v6 }
  0x84   :  { %25 = vst.msk [vmem:[%s61_s1] sm:$0xff] %vm24_vm0, %v31_v7 }
  0x85   :  { %v17_v8 = vpop.permute.xlu0 %16 }
  0x86   :  { %vm19_vm2 = vcmp.eq.s32.totalorder %v11_v4, %v17_v8 }
  0x87   :  { %v32_v9 = vsel %vm19_vm2, 1.0, %v37_v6 }
  0x88   :  { %26 = vst.msk [vmem:[%s61_s1 + $0x8] sm:$0xff] %vm24_vm0, %v32_v9 }

</bundles_post_ra>
